<compile_context>
chip_gen: v6e
topology: v6e:2x2x1
jax: 0.10.0
libtpu: 0.0.40
codegen_flags: <defaults>
</compile_context>

<pallas_src>
import jax
import jax.numpy as jnp
from jax.experimental import pallas as pl
from jax.experimental.pallas import tpu as pltpu

_LANE = 128      # lane width (last dim) alignment
_SUBLANE = 8     # sublane (second-to-last dim) alignment
_TB = 512        # batch tile rows for the batch-tiled (large B) path


def _round_up(x, m):
    return ((x + m - 1) // m) * m


def _agent_mlp_kernel(x_ref, w1_ref, b1_ref, w2_ref, b2_ref, o_ref):
    # hidden = relu(x @ w1 + b1), bf16 operands, f32 accumulation
    h = jnp.dot(x_ref[...], w1_ref[...], preferred_element_type=jnp.float32)
    h = jnp.maximum(h + b1_ref[...], 0.0)
    # out = hidden @ w2 + b2 (hidden recast to bf16 for the native MXU path)
    o = jnp.dot(h.astype(w2_ref.dtype), w2_ref[...],
                preferred_element_type=jnp.float32)
    o_ref[...] = o + b2_ref[...]


@jax.jit
def _agent_mlp_padded(x_pad, w1, b1, w2, b2):
    """Runs the fused MLP on lane/sublane-padded operands.

    x_pad: bf16[B_pad, D_pad], w1: bf16[D_pad, H_pad], b1: f32[1, H_pad],
    w2: bf16[H_pad, O_pad],   b2: f32[1, O_pad]  ->  f32[B_pad, O_pad]
    """
    Bp, Dp = x_pad.shape
    Hp = w1.shape[1]
    Op = w2.shape[1]

    if Bp <= _TB:
        # Small-batch path: no grid at all; every operand is a single
        # VMEM-resident tile and the output store is lane-dense (128-wide).
        return pl.pallas_call(
            _agent_mlp_kernel,
            out_shape=jax.ShapeDtypeStruct((Bp, Op), jnp.float32),
        )(x_pad, w1, b1, w2, b2)

    # Large-batch path: tile only over B. Weights/biases use constant block
    # indices so they stay resident in VMEM across grid steps; the batch axis
    # is "parallel" so it can be sharded across TensorCores (v7x megacore).
    grid = (Bp // _TB,)
    return pl.pallas_call(
        _agent_mlp_kernel,
        out_shape=jax.ShapeDtypeStruct((Bp, Op), jnp.float32),
        grid=grid,
        in_specs=[
            pl.BlockSpec((_TB, Dp), lambda i: (i, 0)),
            pl.BlockSpec((Dp, Hp), lambda i: (0, 0)),
            pl.BlockSpec((1, Hp), lambda i: (0, 0)),
            pl.BlockSpec((Hp, Op), lambda i: (0, 0)),
            pl.BlockSpec((1, Op), lambda i: (0, 0)),
        ],
        out_specs=pl.BlockSpec((_TB, Op), lambda i: (i, 0)),
        compiler_params=pltpu.CompilerParams(
            dimension_semantics=("parallel",)),
    )(x_pad, w1, b1, w2, b2)


def agent_forward_pallas(x, w1_p, b1_p, w2_p, b2_p, num_poses):
    """Trajectory-head MLP. x: f32[B, D] -> f32[B, num_poses, 3].

    w1_p/b1_p/w2_p/b2_p are the lane-padded (and bf16-cast) parameters.
    """
    B, D = x.shape
    Dp = w1_p.shape[0]
    out_dim = num_poses * 3

    # Fixed batch bucket: sublane aligned; once past one tile, a multiple of
    # the batch tile. All B in the same bucket reuse one compiled kernel.
    Bp = max(_SUBLANE, _round_up(B, _SUBLANE))
    if Bp > _TB:
        Bp = _round_up(Bp, _TB)

    x_pad = jnp.zeros((Bp, Dp), jnp.bfloat16)
    x_pad = x_pad.at[:B, :D].set(x.astype(jnp.bfloat16))

    out_pad = _agent_mlp_padded(x_pad, w1_p, b1_p, w2_p, b2_p)
    return out_pad[:B, :out_dim].reshape(B, num_poses, 3)


class PallasAgent:
    """Concrete, minimal realization of navsim's AbstractAgent on TPU/Pallas."""

    def __init__(self, num_poses=8, feature_dim=8, hidden_dim=32,
                 requires_scene=False, seed=0):
        self.requires_scene = requires_scene
        self._num_poses = num_poses          # stands in for TrajectorySampling
        out_dim = num_poses * 3

        key = jax.random.PRNGKey(seed)
        k1, k2, k3, k4 = jax.random.split(key, 4)
        # Deterministic synthetic parameter init (no checkpoint loading).
        self.w1 = jax.random.normal(k1, (feature_dim, hidden_dim), jnp.float32) * 0.1
        self.b1 = jax.random.normal(k2, (1, hidden_dim), jnp.float32) * 0.01
        self.w2 = jax.random.normal(k3, (hidden_dim, out_dim), jnp.float32) * 0.1
        self.b2 = jax.random.normal(k4, (1, out_dim), jnp.float32) * 0.01

        # Lane-padded, bf16 weights (padding is zeros -> semantics unchanged),
        # biases stay f32 for the f32-accumulated adds.
        Dp = _round_up(feature_dim, _LANE)
        Hp = _round_up(hidden_dim, _LANE)
        Op = _round_up(out_dim, _LANE)
        self.w1_p = jnp.zeros((Dp, Hp), jnp.bfloat16).at[
            :feature_dim, :hidden_dim].set(self.w1.astype(jnp.bfloat16))
        self.b1_p = jnp.zeros((1, Hp), jnp.float32).at[:, :hidden_dim].set(self.b1)
        self.w2_p = jnp.zeros((Hp, Op), jnp.bfloat16).at[
            :hidden_dim, :out_dim].set(self.w2.astype(jnp.bfloat16))
        self.b2_p = jnp.zeros((1, Op), jnp.float32).at[:, :out_dim].set(self.b2)

    def name(self):
        return "pallas_agent"

    def forward(self, features):
        """features: {"ego_status": f32[B, D]} -> {"trajectory": f32[B, P, 3]}"""
        x = features["ego_status"].astype(jnp.float32)
        traj = agent_forward_pallas(x, self.w1_p, self.b1_p, self.w2_p,
                                    self.b2_p, self._num_poses)
        return {"trajectory": traj}

    def compute_trajectory(self, ego_status_single):
        """Mirrors AbstractAgent.compute_trajectory: unsqueeze(0) -> forward -> squeeze(0)."""
        feats = {"ego_status": ego_status_single[None, :]}
        preds = self.forward(feats)
        return preds["trajectory"][0]  # [num_poses, 3]


def _reference_forward(x, w1, b1, w2, b2, num_poses):
    """Pure-JAX reference mirroring the kernel numerics (bf16 ops, f32 acc)."""
    xb = x.astype(jnp.bfloat16).astype(jnp.float32)
    w1b = w1.astype(jnp.bfloat16).astype(jnp.float32)
    w2b = w2.astype(jnp.bfloat16).astype(jnp.float32)
    h = jnp.maximum(xb @ w1b + b1, 0.0)
    hb = h.astype(jnp.bfloat16).astype(jnp.float32)
    return (hb @ w2b + b2).reshape(x.shape[0], num_poses, 3)


if __name__ == "__main__":
    key = jax.random.PRNGKey(0)
    B, D, H, P = 2, 8, 32, 8
    agent = PallasAgent(num_poses=P, feature_dim=D, hidden_dim=H, seed=0)

    # --- small-batch (no-grid) path -------------------------------------
    ego_status = jax.random.normal(key, (B, D), jnp.float32)
    preds = agent.forward({"ego_status": ego_status})
    traj = jax.block_until_ready(preds["trajectory"])

    ref = _reference_forward(ego_status, agent.w1, agent.b1, agent.w2,
                             agent.b2, agent._num_poses)
    assert traj.shape == (B, P, 3), traj.shape
    assert jnp.allclose(traj, ref, atol=1e-2, rtol=1e-2), "mismatch vs reference"

    # compute_trajectory path (B=1) reuses the same padded-B=8 compile.
    single_traj = jax.block_until_ready(agent.compute_trajectory(ego_status[0]))
    assert single_traj.shape == (P, 3)
    assert jnp.allclose(single_traj, ref[0], atol=1e-2, rtol=1e-2)

    # --- batch-tiled ("parallel" grid) path ------------------------------
    big_B = 600  # pads to 1024 rows -> grid=(2,) with TB=512
    key_big = jax.random.PRNGKey(1)
    ego_big = jax.random.normal(key_big, (big_B, D), jnp.float32)
    traj_big = jax.block_until_ready(
        agent.forward({"ego_status": ego_big})["trajectory"])
    ref_big = _reference_forward(ego_big, agent.w1, agent.b1, agent.w2,
                                 agent.b2, agent._num_poses)
    assert traj_big.shape == (big_B, P, 3)
    assert jnp.allclose(traj_big, ref_big, atol=1e-2, rtol=1e-2), \
        "mismatch vs reference (tiled path)"

    print("KERNEL_OK")
</pallas_src>

<mosaic_0001>
module attributes {stable_mosaic.version = 11 : i64} {
  func.func @_agent_mlp_kernel(%arg0: memref<8x128xbf16, #tpu.memory_space<vmem>>, %arg1: memref<128x128xbf16, #tpu.memory_space<vmem>>, %arg2: memref<1x128xf32, #tpu.memory_space<vmem>>, %arg3: memref<128x128xbf16, #tpu.memory_space<vmem>>, %arg4: memref<1x128xf32, #tpu.memory_space<vmem>>, %arg5: memref<8x128xf32, #tpu.memory_space<vmem>>) attributes {dimension_semantics = [], scalar_prefetch = 0 : i64, scratch_operands = 0 : i64, tpu.core_type = #tpu.core_type<tc>} {
    %c0 = arith.constant 0 : index
    %c0_0 = arith.constant 0 : index
    %0 = vector.load %arg0[%c0, %c0_0] : memref<8x128xbf16, #tpu.memory_space<vmem>>, vector<8x128xbf16>
    %c0_1 = arith.constant 0 : index
    %c0_2 = arith.constant 0 : index
    %1 = vector.load %arg1[%c0_1, %c0_2] : memref<128x128xbf16, #tpu.memory_space<vmem>>, vector<128x128xbf16>
    %cst = arith.constant dense<0.000000e+00> : vector<8x128xf32>
    %2 = tpu.matmul %0, %1, %cst {dimension_numbers = #tpu.dot_dimension_numbers<[1], [0], [0], [1], [0, 0, 1, 1], [], []>} : vector<8x128xbf16>, vector<128x128xbf16>, vector<8x128xf32> -> vector<8x128xf32>
    %c0_3 = arith.constant 0 : index
    %c0_4 = arith.constant 0 : index
    %3 = vector.load %arg2[%c0_3, %c0_4] : memref<1x128xf32, #tpu.memory_space<vmem>>, vector<1x128xf32>
    %4 = vector.broadcast %3 : vector<1x128xf32> to vector<8x128xf32>
    %5 = arith.addf %2, %4 : vector<8x128xf32>
    %cst_5 = arith.constant 0.000000e+00 : f32
    %6 = vector.broadcast %cst_5 : f32 to vector<8x128xf32>
    %7 = arith.maximumf %5, %6 : vector<8x128xf32>
    %8 = arith.truncf %7 : vector<8x128xf32> to vector<8x128xbf16>
    %c0_6 = arith.constant 0 : index
    %c0_7 = arith.constant 0 : index
    %9 = vector.load %arg3[%c0_6, %c0_7] : memref<128x128xbf16, #tpu.memory_space<vmem>>, vector<128x128xbf16>
    %cst_8 = arith.constant dense<0.000000e+00> : vector<8x128xf32>
    %10 = tpu.matmul %8, %9, %cst_8 {dimension_numbers = #tpu.dot_dimension_numbers<[1], [0], [0], [1], [0, 0, 1, 1], [], []>} : vector<8x128xbf16>, vector<128x128xbf16>, vector<8x128xf32> -> vector<8x128xf32>
    %c0_9 = arith.constant 0 : index
    %c0_10 = arith.constant 0 : index
    %11 = vector.load %arg4[%c0_9, %c0_10] : memref<1x128xf32, #tpu.memory_space<vmem>>, vector<1x128xf32>
    %12 = vector.broadcast %11 : vector<1x128xf32> to vector<8x128xf32>
    %13 = arith.addf %10, %12 : vector<8x128xf32>
    %c0_11 = arith.constant 0 : index
    %c0_12 = arith.constant 0 : index
    %14 = vector.load %arg5[%c0_11, %c0_12] : memref<8x128xf32, #tpu.memory_space<vmem>>, vector<8x128xf32>
    tpu.vector_store %arg5[%c0_11, %c0_12], %13 {strides = array<i32>} : memref<8x128xf32, #tpu.memory_space<vmem>>, vector<8x128xf32>,
    return
  }
}

</mosaic_0001>

<bundles_post_ra>
// kernel: _agent_mlp_padded.1
= control target key start
LH: loop header
LB: loop body
LE: loop exit
PB: predicated region body
PF: predicated region fallthrough
CT: control target
= control target key end

     0   :  { %10 = vsyncpa [#allocation3], 0  ;;  %s545_s0 = inlined_call_operand.hbm [shape: bf16[8,128], index: 0, kind: input, shape index: {}]   ;;  %s546_s1 = inlined_call_operand.hbm [shape: bf16[128,128], index: 1, kind: input, shape index: {}]   ;;  %s547_s2 = inlined_call_operand.vmem [shape: f32[1,128], index: 2, kind: input, shape index: {}]   ;;  %s548_s3 = inlined_call_operand.hbm [shape: bf16[128,128], index: 3, kind: input, shape index: {}]   ;;  %s549_s4 = inlined_call_operand.vmem [shape: f32[1,128], index: 4, kind: input, shape index: {}]   ;;  %s550_s5 = inlined_call_operand.hbm [shape: f32[8,128], index: 5, kind: output, shape index: {}]  }
   0x1   :  { %11 = vsyncpa [#allocation6], 0 }
   0x2   :  { %12 = vsyncpa [#allocation4], 0  ;;  %s489_s18 = smov [#allocation5]  }
   0x3   :  { %s28_s19 = sshll.u32 %s489_s18, 4  ;;  %s29_s19 = int_to_ptr.vmem [resolvable:$true] %s28_s19 }
   0x4   :  { %s411_s20 = scalar_lea.vmem %s29_s19, 1024  ;;  %p416_p1 = scmp.lt.s32.totalorder %s29_s19, %s29_s19 }
   0x5   :  { %p412_p0 = scmp.ne.s32.totalorder %s29_s19, %s411_s20  ;;  %p417_p2 = scmp.lt.s32.totalorder %s411_s20, %s411_s20 }
   0x7   :  { %p418_p3 = por %p417_p2, %p416_p1 }
   0x9   :  { %p419_p4 = pnand %p418_p3, %p412_p0 }
   0xb   :  { %422 = shalt.err (!%p419_p4)
}
   0xc   :  { %s490_s21 = smov 64   ;;  %s491_s22 = smov 4  }
   0xd   :  { %34 = dma.hbm_to_vmem [thread:$0]  %s546_s1, 1024, %s29_s19, [#allocation6], %s490_s21, %s490_s21, %s491_s22  }
   0xe   :  { %s492_s25 = smov [#allocation2]   ;;  %s493_s27 = smov [#allocation7]  }
   0xf   :  { %s19_s26 = sshll.u32 %s492_s25, 4  ;;  %s42_s28 = sshll.u32 %s493_s27, 4  ;;  %s20_s26 = int_to_ptr.vmem [resolvable:$true] %s19_s26  ;;  %s43_s28 = int_to_ptr.vmem [resolvable:$true] %s42_s28 }
  0x10   :  { %s431_s29 = scalar_lea.vmem %s20_s26, 64  ;;  %p436_p6 = scmp.lt.s32.totalorder %s20_s26, %s20_s26 }
  0x11   :  { %p432_p5 = scmp.ne.s32.totalorder %s20_s26, %s431_s29  ;;  %p437_p7 = scmp.lt.s32.totalorder %s431_s29, %s431_s29 }
  0x13   :  { %p438_p8 = por %p437_p7, %p436_p6 }
  0x15   :  { %p439_p9 = pnand %p438_p8, %p432_p5 }
  0x17   :  { %442 = shalt.err (!%p439_p9)
}
  0x18   :  { %22 = dma.hbm_to_vmem [thread:$0]  %s545_s0, 64, %s20_s26, [#allocation3]  }
  0x19   :  { %s451_s7 = scalar_lea.vmem %s43_s28, 1024  ;;  %p456_p11 = scmp.lt.s32.totalorder %s43_s28, %s43_s28 }
  0x1a   :  { %p452_p10 = scmp.ne.s32.totalorder %s43_s28, %s451_s7  ;;  %p457_p12 = scmp.lt.s32.totalorder %s451_s7, %s451_s7 }
  0x1c   :  { %p458_p13 = por %p457_p12, %p456_p11 }
  0x1e   :  { %p459_p0 = pnand %p458_p13, %p452_p10 }
  0x20   :  { %462 = shalt.err (!%p459_p0)
}
  0x21   :  { %48 = dma.hbm_to_vmem [thread:$0]  %s548_s3, 1024, %s43_s28, [#allocation6], %s490_s21, %s490_s21, %s491_s22  }
  0x22   :  { %483 = dma.done.wait [#allocation3], 64  }
  0x23   :  { %484 = vsyncadd [#allocation3], 4294967232 }
  0x24   :  { %485 = dma.done.wait [#allocation6], 2048  }
  0x25   :  { %486 = vsyncadd [#allocation6], 4294965248  ;;  %v494_v0 = vmov 0.0   ;;  %vm495_vm0 = vmmov 0   ;;  %v387_v1 = vld [vmem:[#allocation5 + $0x38] sm:$0xff]   ;;  %v388_v2 = vld [vmem:[#allocation5 + $0x30] sm:$0xff]  }
  0x26   :  { %339 = vmatprep.subr.bf16.mxu0 %v494_v0  ;;  %355 = vmatprep.mubr.msk.bf16.mxu0 %vm495_vm0, %v494_v0  ;;  %v389_v3 = vld [vmem:[#allocation5 + $0x28] sm:$0xff]   ;;  %v395_v4 = vld [vmem:[#allocation7 + $0x38] sm:$0xff]   ;;  %v390_v5 = vld [vmem:[#allocation5 + $0x20] sm:$0xff]   ;;  %s496_s11 = smov [#allocation8]  }
  0x27   :  { %359 = vmatprep.subr.bf16.mxu1 %v494_v0  ;;  %375 = vmatprep.mubr.msk.bf16.mxu1 %vm495_vm0, %v494_v0  ;;  %v396_v6 = vld [vmem:[#allocation7 + $0x30] sm:$0xff]   ;;  %v391_v7 = vld [vmem:[#allocation5 + $0x18] sm:$0xff]   ;;  %v397_v8 = vld [vmem:[#allocation7 + $0x28] sm:$0xff]   ;;  %s293_s12 = sshll.u32 %s496_s11, 4  ;;  %s294_s12 = int_to_ptr.vmem [resolvable:$true] %s293_s12 }
  0x28   :  { %340 = vmatpush3.bf16.msra.mxu0 %v387_v1  ;;  %360 = vmatpush3.bf16.msra.mxu1 %v395_v4  ;;  %v392_v9 = vld [vmem:[#allocation5 + $0x10] sm:$0xff]   ;;  %v398_v10 = vld [vmem:[#allocation7 + $0x20] sm:$0xff]   ;;  %v393_v11 = vld [vmem:[#allocation5 + $0x8] sm:$0xff]   ;;  %p468_p2 = scmp.lt.s32.totalorder %s294_s12, %s294_s12 }
  0x29   :  { %341 = vmatprep.subr.bf16.mxu0 %v494_v0  ;;  %361 = vmatprep.subr.bf16.mxu1 %v494_v0  ;;  %v399_v12 = vld [vmem:[#allocation7 + $0x18] sm:$0xff]   ;;  %v394_v13 = vld [vmem:[#allocation5] sm:$0xff]   ;;  %v400_v14 = vld [vmem:[#allocation7 + $0x10] sm:$0xff]  }
  0x2a   :  { %v61_v15 = vld [vmem:[#allocation2] sm:$0xf]  ;;  %v401_v16 = vld [vmem:[#allocation7 + $0x8] sm:$0xff]   ;;  %v402_v17 = vld [vmem:[#allocation7] sm:$0xff]  }
  0x2b   :  { %v303_v18 = vld [vmem:[%s547_s2] ss:$0 sm:$0xff]  ;;  %s463_s2 = scalar_lea.vmem %s294_s12, 128 }
  0x2c   :  { %342 = vmatpush3.bf16.msra.mxu0 %v388_v2  ;;  %362 = vmatpush3.bf16.msra.mxu1 %v396_v6  ;;  %v312_v26 = vld [vmem:[%s549_s4] ss:$0 sm:$0xff]  ;;  %p464_p1 = scmp.ne.s32.totalorder %s294_s12, %s463_s2  ;;  %p469_p3 = scmp.lt.s32.totalorder %s463_s2, %s463_s2 }
  0x2d   :  { %343 = vmatprep.subr.bf16.mxu0 %v494_v0  ;;  %363 = vmatprep.subr.bf16.mxu1 %v494_v0 }
  0x2e   :  { %p470_p4 = por %p469_p3, %p468_p2 }
  0x30   :  { %344 = vmatpush3.bf16.msra.mxu0 %v389_v3  ;;  %364 = vmatpush3.bf16.msra.mxu1 %v397_v8  ;;  %p471_p5 = pnand %p470_p4, %p464_p1 }
  0x31   :  { %345 = vmatprep.subr.bf16.mxu0 %v494_v0  ;;  %365 = vmatprep.subr.bf16.mxu1 %v494_v0 }
  0x34   :  { %346 = vmatpush3.bf16.msra.mxu0 %v390_v5  ;;  %366 = vmatpush3.bf16.msra.mxu1 %v398_v10 }
  0x35   :  { %347 = vmatprep.subr.bf16.mxu0 %v494_v0  ;;  %367 = vmatprep.subr.bf16.mxu1 %v494_v0 }
  0x38   :  { %348 = vmatpush3.bf16.msra.mxu0 %v391_v7  ;;  %368 = vmatpush3.bf16.msra.mxu1 %v399_v12 }
  0x39   :  { %349 = vmatprep.subr.bf16.mxu0 %v494_v0  ;;  %369 = vmatprep.subr.bf16.mxu1 %v494_v0 }
  0x3c   :  { %350 = vmatpush3.bf16.msra.mxu0 %v392_v9  ;;  %370 = vmatpush3.bf16.msra.mxu1 %v400_v14 }
  0x3d   :  { %351 = vmatprep.subr.bf16.mxu0 %v494_v0  ;;  %371 = vmatprep.subr.bf16.mxu1 %v494_v0 }
  0x40   :  { %352 = vmatpush3.bf16.msra.mxu0 %v393_v11  ;;  %372 = vmatpush3.bf16.msra.mxu1 %v401_v16 }
  0x41   :  { %353 = vmatprep.subr.bf16.mxu0 %v494_v0  ;;  %373 = vmatprep.subr.bf16.mxu1 %v494_v0 }
  0x44   :  { %354 = vmatpush3.bf16.msra.mxu0 %v394_v13  ;;  %374 = vmatpush3.bf16.msra.mxu1 %v402_v17 }
  0x47   :  { %356 = vmatmul.mubr.bf16.vlgmr.msra.gmra.mxu0 %v61_v15 }
 0x107   :  { %v167_v19 = vpop.f32.mrf.mxu0 }
 0x108   :  { %v168_v20 = vadd.f32 %v303_v18, %v167_v19 }
 0x109   :  { %v357_v21 = vpop.f32.mrf.mxu0 }
 0x10a   :  { %v173_v22 = vmax.f32 %v168_v20, 0.0 }
 0x10b   :  { %v170_v23 = vpop.f32.mrf.mxu0 }
 0x10c   :  { %v174_v24 = vpack.c.bf16 %v173_v22, %v173_v22 }
 0x10d   :  { %v358_v25 = vpop.f32.mrf.mxu0 }
 0x10e   :  { %376 = vmatmul.mubr.bf16.vlgmr.msra.gmra.mxu1 %v174_v24 }
 0x1ce   :  { %v280_v27 = vpop.f32.mrf.mxu1 }
 0x1cf   :  { %v281_v28 = vadd.f32 %v312_v26, %v280_v27 }
 0x1d0   :  { %v377_v29 = vpop.f32.mrf.mxu1 }
 0x1d1   :  { %286 = vst [vmem:[#allocation8] sm:$0xff] %v281_v28 }
 0x1d2   :  { %v283_v30 = vpop.f32.mrf.mxu1 }
 0x1d3   :  { %474 = shalt.err (!%p471_p5)
}
 0x1d4   :  { %296 = dma.vmem_to_hbm [thread:$0]  %s294_s12, 128, %s550_s5, [#allocation4]   ;;  %v378_v31 = vpop.f32.mrf.mxu1 }
 0x1d5   :  { %487 = dma.done.wait [#allocation4], 128  }
 0x1d6   :  { %488 = vsyncadd [#allocation4], 4294967168 }
 0x1d7   :  { %300 = vsyncpa [#allocation3], 1 }
 0x1d8   :  { %301 = vsyncpa [#allocation6], 1 }
 0x1d9   :  { %302 = vsyncpa [#allocation4], 1 }

</bundles_post_ra>
